<compile_context>
chip_gen: v7x
topology: tpu7x:2x2x1
jax: 0.10.0
libtpu: 0.0.40
codegen_flags: <defaults>
</compile_context>

<pallas_src>
import functools

import jax
import jax.numpy as jnp
from jax.experimental import pallas as pl
from jax.experimental.pallas import tpu as pltpu


def _cdiv(a: int, b: int) -> int:
    return -(-a // b)


def _round_up(v: int, m: int) -> int:
    return ((v + m - 1) // m) * m


def _fit_tile(dim: int, tile_max: int, align: int) -> int:
    """Largest tile <= tile_max (align-multiple) that minimizes padding of `dim`."""
    if dim <= 0:
        return align
    n_blocks = _cdiv(dim, tile_max)
    return _round_up(_cdiv(dim, n_blocks), align)


def _vmem_limit_bytes() -> int:
    """Per-generation scoped-VMEM limit: ~0.75 * physical, capped at 100 MiB."""
    try:
        cap = int(pltpu.get_tpu_info().vmem_capacity_bytes)
    except Exception:
        # Unknown chip: 64 MiB is safe on every generation (v7x physical VMEM).
        return 64 * 1024 * 1024
    return min(cap * 3 // 4, 100 * 1024 * 1024)


def linear_kernel(x_ref, w_ref, b_ref, o_ref):
    # Output block index is (i, j) for every k -> o_ref is VMEM-resident across
    # the whole K reduction and acts as the (f32) accumulator.
    @pl.when(pl.program_id(2) == 0)
    def _init():
        # Seed the accumulator with the broadcast bias: no epilogue add needed.
        o_ref[...] = jnp.broadcast_to(
            b_ref[...].astype(jnp.float32), o_ref.shape
        )

    # MXU matmul (bf16 or f32 inputs) with f32 accumulation into the output tile.
    o_ref[...] += jnp.dot(
        x_ref[...], w_ref[...], preferred_element_type=jnp.float32
    )


@functools.partial(
    jax.jit, static_argnames=("tm", "tn", "tk", "compute_dtype", "w_buffers")
)
def linear(
    x,
    w,
    b,
    *,
    tm: int = 512,
    tn: int = 1024,
    tk: int = 512,
    compute_dtype=jnp.bfloat16,
    w_buffers: int = 2,
):
    """y = x @ w + b via a tiled Pallas TPU kernel.

    x: (N, K), w: (K, M), b: (M,)  ->  y: (N, M) in float32.
    `compute_dtype` controls the MXU input dtype (bf16 default, f32 for exact).
    """
    N, K = x.shape
    K2, M = w.shape
    assert K == K2, (K, K2)
    assert b.shape == (M,), b.shape

    # --- Tile selection: minimize padding while staying (8, 128)-aligned. ----
    tm = _fit_tile(N, tm, 8)
    tn = _fit_tile(M, tn, 128)
    tk = _fit_tile(K, tk, 128)
    Np, Kp, Mp = _round_up(N, tm), _round_up(K, tk), _round_up(M, tn)

    # Make sure at least one "parallel" grid axis has >= 2 blocks so both v7x
    # TensorCores get work (one extra ~0.35 us grid step on single-TC chips).
    if Np // tm == 1 and Mp // tn == 1:
        if tn >= 256:
            tn = _round_up(_cdiv(M, 2), 128)
            Mp = _round_up(M, tn)
        elif tm >= 16:
            tm = _round_up(_cdiv(N, 2), 8)
            Np = _round_up(N, tm)

    # --- Cast to the compute dtype (bf16 -> full-rate MXU, f32 accumulate). --
    cdt = jnp.dtype(compute_dtype)
    xc = x if x.dtype == cdt else x.astype(cdt)
    wc = w if w.dtype == cdt else w.astype(cdt)

    # --- Pad only when needed (zero-copy path for tile-multiple shapes). -----
    # Zero padding along K contributes nothing to the reduction, so results
    # for the valid region are exact.
    if (Np, Kp) != (N, K):
        xc = jnp.pad(xc, ((0, Np - N), (0, Kp - K)))
    if (Kp, Mp) != (K, M):
        wc = jnp.pad(wc, ((0, Kp - K), (0, Mp - M)))
    bc = b if Mp == M else jnp.pad(b, (0, Mp - M))
    bc = bc.reshape(1, Mp)  # bias stays f32; it only feeds the f32 accumulator

    grid = (Np // tm, Mp // tn, Kp // tk)  # reduction axis last

    # Weight-panel BlockSpec; optionally deepen its pipeline (sweep on v7x if
    # profiling shows exposed DMA after enlarging tn).
    if w_buffers != 2:
        w_spec = pl.BlockSpec(
            (tk, tn), lambda i, j, k: (k, j), pipeline_mode=pl.Buffered(w_buffers)
        )
    else:
        w_spec = pl.BlockSpec((tk, tn), lambda i, j, k: (k, j))

    y_p = pl.pallas_call(
        linear_kernel,
        out_shape=jax.ShapeDtypeStruct((Np, Mp), jnp.float32),
        grid_spec=pl.GridSpec(
            grid=grid,
            in_specs=[
                pl.BlockSpec((tm, tk), lambda i, j, k: (i, k)),  # x tile
                w_spec,                                          # w tile
                pl.BlockSpec((1, tn), lambda i, j, k: (0, j)),   # bias (K-invariant)
            ],
            out_specs=pl.BlockSpec((tm, tn), lambda i, j, k: (i, j)),
        ),
        compiler_params=pltpu.CompilerParams(
            dimension_semantics=("parallel", "parallel", "arbitrary"),
            vmem_limit_bytes=_vmem_limit_bytes(),
        ),
    )(xc, wc, bc)

    if (Np, Mp) != (N, M):
        y_p = y_p[:N, :M]
    return y_p


if __name__ == "__main__":
    # Small shapes consistent with the module's forward:
    #   x (batch, in_features), w (in_features, out_features), b (out_features,)
    in_features, out_features = 32, 128
    batch = 8

    key = jax.random.PRNGKey(0)
    kx, kw, kb = jax.random.split(key, 3)
    x = jax.random.normal(kx, (batch, in_features), dtype=jnp.float32)
    w = jax.random.normal(kw, (in_features, out_features), dtype=jnp.float32)
    b = jax.random.normal(kb, (out_features,), dtype=jnp.float32)

    y_ref = x @ w + b[None, :]

    # Exact path: f32 compute matches the f32 PyTorch module tightly.
    y_f32 = jax.block_until_ready(linear(x, w, b, compute_dtype=jnp.float32))
    assert y_f32.shape == (batch, out_features)
    assert jnp.allclose(y_f32, y_ref, atol=1e-5, rtol=1e-5)

    # Default fast path: bf16 MXU inputs with f32 accumulation (looser tolerance).
    y_bf16 = jax.block_until_ready(linear(x, w, b))
    assert y_bf16.shape == (batch, out_features)
    assert jnp.allclose(y_bf16, y_ref, atol=1e-1, rtol=2e-2)

    print("KERNEL_OK")
</pallas_src>

<mosaic_0001>
module attributes {stable_mosaic.version = 11 : i64} {
  func.func @linear_kernel(%arg0: i32, %arg1: i32, %arg2: i32, %arg3: memref<8x128xf32, #tpu.memory_space<vmem>>, %arg4: memref<128x128xf32, #tpu.memory_space<vmem>>, %arg5: memref<1x128xf32, #tpu.memory_space<vmem>>, %arg6: memref<8x128xf32, #tpu.memory_space<vmem>>) attributes {dimension_semantics = [#tpu.dimension_semantics<parallel>, #tpu.dimension_semantics<parallel>, #tpu.dimension_semantics<arbitrary>], iteration_bounds = array<i64: 1, 1, 1>, scalar_prefetch = 0 : i64, scratch_operands = 0 : i64, tpu.core_type = #tpu.core_type<tc>, window_params = [{transform_indices = @transform_0, window_bounds = array<i64: 8, 128>}, {transform_indices = @transform_1, window_bounds = array<i64: 128, 128>}, {transform_indices = @transform_2, window_bounds = array<i64: 1, 128>}, {transform_indices = @transform_3, window_bounds = array<i64: 8, 128>}]} {
    %c0_i32 = arith.constant 0 : i32
    %0 = arith.cmpi eq, %arg2, %c0_i32 : i32
    %1 = arith.extui %0 : i1 to i32
    %c0_i32_0 = arith.constant 0 : i32
    %2 = arith.cmpi ne, %1, %c0_i32_0 : i32
    scf.if %2 {
      %c0_8 = arith.constant 0 : index
      %c0_9 = arith.constant 0 : index
      %9 = vector.load %arg5[%c0_8, %c0_9] : memref<1x128xf32, #tpu.memory_space<vmem>>, vector<1x128xf32>
      %10 = vector.shape_cast %9 : vector<1x128xf32> to vector<1x128xf32>
      %11 = vector.broadcast %10 : vector<1x128xf32> to vector<8x128xf32>
      %c0_10 = arith.constant 0 : index
      %c0_11 = arith.constant 0 : index
      %12 = vector.load %arg6[%c0_10, %c0_11] : memref<8x128xf32, #tpu.memory_space<vmem>>, vector<8x128xf32>
      tpu.vector_store %arg6[%c0_10, %c0_11], %11 {strides = array<i32>} : memref<8x128xf32, #tpu.memory_space<vmem>>, vector<8x128xf32>,
    } else {
    }
    %c0 = arith.constant 0 : index
    %c0_1 = arith.constant 0 : index
    %3 = vector.load %arg6[%c0, %c0_1] : memref<8x128xf32, #tpu.memory_space<vmem>>, vector<8x128xf32>
    %c0_2 = arith.constant 0 : index
    %c0_3 = arith.constant 0 : index
    %4 = vector.load %arg3[%c0_2, %c0_3] : memref<8x128xf32, #tpu.memory_space<vmem>>, vector<8x128xf32>
    %c0_4 = arith.constant 0 : index
    %c0_5 = arith.constant 0 : index
    %5 = vector.load %arg4[%c0_4, %c0_5] : memref<128x128xf32, #tpu.memory_space<vmem>>, vector<128x128xf32>
    %cst = arith.constant dense<0.000000e+00> : vector<8x128xf32>
    %6 = tpu.matmul %4, %5, %cst {dimension_numbers = #tpu.dot_dimension_numbers<[1], [0], [0], [1], [0, 0, 1, 1], [], []>} : vector<8x128xf32>, vector<128x128xf32>, vector<8x128xf32> -> vector<8x128xf32>
    %7 = arith.addf %3, %6 : vector<8x128xf32>
    %c0_6 = arith.constant 0 : index
    %c0_7 = arith.constant 0 : index
    %8 = vector.load %arg6[%c0_6, %c0_7] : memref<8x128xf32, #tpu.memory_space<vmem>>, vector<8x128xf32>
    tpu.vector_store %arg6[%c0_6, %c0_7], %7 {strides = array<i32>} : memref<8x128xf32, #tpu.memory_space<vmem>>, vector<8x128xf32>,
    return
  }
  func.func @transform_0(%arg0: i32, %arg1: i32, %arg2: i32) -> (i32, i32) {
    %c0_i32 = arith.constant 0 : i32
    return %arg0, %arg2 : i32, i32
  }
  func.func @transform_1(%arg0: i32, %arg1: i32, %arg2: i32) -> (i32, i32) {
    %c0_i32 = arith.constant 0 : i32
    return %arg2, %arg1 : i32, i32
  }
  func.func @transform_2(%arg0: i32, %arg1: i32, %arg2: i32) -> (i32, i32) {
    %c0_i32 = arith.constant 0 : i32
    %c0_i32_0 = arith.constant 0 : i32
    return %c0_i32, %arg1 : i32, i32
  }
  func.func @transform_3(%arg0: i32, %arg1: i32, %arg2: i32) -> (i32, i32) {
    %c0_i32 = arith.constant 0 : i32
    return %arg0, %arg1 : i32, i32
  }
}

</mosaic_0001>

<bundles_post_ra>
// kernel: linear.1
= control target key start
LH: loop header
LB: loop body
LE: loop exit
PB: predicated region body
PF: predicated region fallthrough
CT: control target
= control target key end

     0   :  { %8 = vsyncpa [#allocation3], 0  ;;  %s427_s0 = inlined_call_operand.hbm [shape: f32[8,128], index: 0, kind: input, shape index: {}]   ;;  %s428_s1 = inlined_call_operand.hbm [shape: f32[128,128], index: 1, kind: input, shape index: {}]   ;;  %s429_s2 = inlined_call_operand.hbm [shape: f32[1,128], index: 2, kind: input, shape index: {}]   ;;  %s430_s3 = inlined_call_operand.hbm [shape: f32[8,128], index: 3, kind: output, shape index: {}]  }
   0x1   :  { %9 = vsyncpa [#allocation6], 0 }
   0x2   :  { %10 = vsyncpa [#allocation4], 0  ;;  %s350_s12 = smov [#allocation5]   ;;  %s256_s16 = scalar_lea.hbm %s428_s1, 2048 }
   0x3   :  { %s26_s13 = sshll.u32 %s350_s12, 4  ;;  %p257_p0 = scmp.ne.s32.totalorder %s428_s1, %s256_s16  ;;  %s27_s13 = int_to_ptr.vmem [resolvable:$true] %s26_s13 }
   0x4   :  { %p260_p1 = scmp.lt.u32.totalorder %s256_s16, %s428_s1 }
   0x6   :  { %p262_p2 = pnand %p260_p1, %p257_p0 }
   0x8   :  { %265 = shalt.err (!%p262_p2)
}
   0x9   :  { %s266_s21 = scalar_lea.vmem %s27_s13, 2048  ;;  %p271_p4 = scmp.lt.s32.totalorder %s27_s13, %s27_s13 }
   0xa   :  { %p267_p3 = scmp.ne.s32.totalorder %s27_s13, %s266_s21  ;;  %p272_p5 = scmp.lt.s32.totalorder %s266_s21, %s266_s21 }
   0xc   :  { %p273_p6 = por %p272_p5, %p271_p4 }
   0xe   :  { %p274_p7 = pnand %p273_p6, %p267_p3 }
  0x10   :  { %277 = shalt.err (!%p274_p7)
}
  0x11   :  { %s351_s22 = smov 128   ;;  %s352_s23 = smov 8  }
  0x12   :  { %32 = dma.hbm_to_vmem [thread:$0]  %s428_s1, 2048, %s27_s13, [#allocation6], %s351_s22, %s351_s22, %s352_s23  }
  0x13   :  { %s353_s26 = smov [#allocation2]   ;;  %s354_s28 = smov [#allocation7]  }
  0x14   :  { %s17_s27 = sshll.u32 %s353_s26, 4  ;;  %s39_s29 = sshll.u32 %s354_s28, 4  ;;  %s18_s27 = int_to_ptr.vmem [resolvable:$true] %s17_s27  ;;  %s40_s29 = int_to_ptr.vmem [resolvable:$true] %s39_s29 }
  0x15   :  { %s278_s5 = scalar_lea.hbm %s427_s0, 128 }
  0x16   :  { %p279_p8 = scmp.ne.s32.totalorder %s427_s0, %s278_s5  ;;  %p282_p9 = scmp.lt.u32.totalorder %s278_s5, %s427_s0 }
  0x18   :  { %p284_p10 = pnand %p282_p9, %p279_p8 }
  0x1a   :  { %287 = shalt.err (!%p284_p10)
}
  0x1b   :  { %s288_s1 = scalar_lea.vmem %s18_s27, 128  ;;  %p293_p12 = scmp.lt.s32.totalorder %s18_s27, %s18_s27 }
  0x1c   :  { %p289_p11 = scmp.ne.s32.totalorder %s18_s27, %s288_s1  ;;  %p294_p13 = scmp.lt.s32.totalorder %s288_s1, %s288_s1 }
  0x1e   :  { %p295_p0 = por %p294_p13, %p293_p12 }
  0x20   :  { %p296_p1 = pnand %p295_p0, %p289_p11 }
  0x22   :  { %299 = shalt.err (!%p296_p1)
}
  0x23   :  { %20 = dma.hbm_to_vmem [thread:$0]  %s427_s0, 128, %s18_s27, [#allocation3]  }
  0x24   :  { %s300_s14 = scalar_lea.hbm %s429_s2, 16 }
  0x25   :  { %p301_p2 = scmp.ne.s32.totalorder %s429_s2, %s300_s14  ;;  %p304_p3 = scmp.lt.u32.totalorder %s300_s14, %s429_s2 }
  0x27   :  { %p306_p4 = pnand %p304_p3, %p301_p2 }
  0x29   :  { %309 = shalt.err (!%p306_p4)
}
  0x2a   :  { %s310_s19 = scalar_lea.vmem %s40_s29, 16  ;;  %s314_s20 = scalar_lea.vmem %s40_s29, 32 }
  0x2b   :  { %p311_p5 = scmp.ne.s32.totalorder %s40_s29, %s310_s19  ;;  %p315_p6 = scmp.lt.s32.totalorder %s40_s29, %s40_s29 }
  0x2c   :  { %p316_p7 = scmp.lt.s32.totalorder %s314_s20, %s310_s19 }
  0x2e   :  { %p317_p8 = por %p316_p7, %p315_p6 }
  0x30   :  { %p318_p9 = pnand %p317_p8, %p311_p5 }
  0x32   :  { %321 = shalt.err (!%p318_p9)
}
  0x33   :  { %42 = dma.hbm_to_vmem [thread:$0]  %s429_s2, 16, %s40_s29, [#allocation6]  }
  0x34   :  { %344 = dma.done.wait [#allocation3], 128  }
  0x35   :  { %345 = vsyncadd [#allocation3], 4294967168 }
  0x36   :  { %346 = dma.done.wait [#allocation6], 2064  }
  0x37   :  { %347 = vsyncadd [#allocation6], 4294965232  ;;  %v355_v0 = vmov 0.0|0.0   ;;  %vm356_vm0 = vmmov 0   ;;  %v357_v1 = vmov 0.0   ;;  %v66_v2 = vld [vmem:[#allocation5] sm:$0xff] }
  0x38   :  { %223 = vmatprep.subr.bf16.mxu0 %v355_v0  ;;  %220 = vmatprep.mubr.msk.f32.mxu0 %vm356_vm0, %v357_v1  ;;  %v67_v3 = vld [vmem:[#allocation5 + $0x8] sm:$0xff]  ;;  %v68_v4 = vld [vmem:[#allocation5 + $0x10] sm:$0xff]  ;;  %v69_v6 = vld [vmem:[#allocation5 + $0x18] sm:$0xff]  ;;  %s358_s2 = smov [#allocation8]  }
  0x39   :  { %v224_v5 = vpack.c.bf16 %v67_v3, %v66_v2  ;;  %v227_v7 = vpack.c.bf16 %v69_v6, %v68_v4  ;;  %v70_v8 = vld [vmem:[#allocation5 + $0x20] sm:$0xff]  ;;  %v71_v9 = vld [vmem:[#allocation5 + $0x28] sm:$0xff]  ;;  %v72_v11 = vld [vmem:[#allocation5 + $0x30] sm:$0xff]  ;;  %s160_s22 = sshll.u32 %s358_s2, 4  ;;  %s161_s22 = int_to_ptr.vmem [resolvable:$true] %s160_s22 }
  0x3a   :  { %v230_v10 = vpack.c.bf16 %v71_v9, %v70_v8  ;;  %v73_v12 = vld [vmem:[#allocation5 + $0x38] sm:$0xff]  ;;  %v74_v14 = vld [vmem:[#allocation5 + $0x40] sm:$0xff]  ;;  %v75_v15 = vld [vmem:[#allocation5 + $0x48] sm:$0xff]  ;;  %s322_s23 = scalar_lea.vmem %s161_s22, 128  ;;  %p327_p11 = scmp.lt.s32.totalorder %s161_s22, %s161_s22 }
  0x3b   :  { %225 = vmatpush3.bf16.msra.mxu0 %v224_v5  ;;  %v233_v13 = vpack.c.bf16 %v73_v12, %v72_v11  ;;  %v236_v16 = vpack.c.bf16 %v75_v15, %v74_v14  ;;  %v76_v17 = vld [vmem:[#allocation5 + $0x50] sm:$0xff]  ;;  %v77_v18 = vld [vmem:[#allocation5 + $0x58] sm:$0xff]  ;;  %v78_v20 = vld [vmem:[#allocation5 + $0x60] sm:$0xff]  ;;  %p323_p10 = scmp.ne.s32.totalorder %s161_s22, %s322_s23  ;;  %p328_p12 = scmp.lt.s32.totalorder %s322_s23, %s322_s23 }
  0x3c   :  { %226 = vmatprep.subr.bf16.mxu0 %v355_v0  ;;  %v239_v19 = vpack.c.bf16 %v77_v18, %v76_v17  ;;  %v79_v21 = vld [vmem:[#allocation5 + $0x68] sm:$0xff]  ;;  %v80_v23 = vld [vmem:[#allocation5 + $0x70] sm:$0xff]  ;;  %v81_v24 = vld [vmem:[#allocation5 + $0x78] sm:$0xff] }
  0x3d   :  { %v242_v22 = vpack.c.bf16 %v79_v21, %v78_v20  ;;  %v245_v25 = vpack.c.bf16 %v81_v24, %v80_v23  ;;  %v65_v26 = vld [vmem:[#allocation2] sm:$0xff]  ;;  %v170_v27 = vld [vmem:[#allocation7] ss:$0 sm:$0xff]  ;;  %p329_p13 = por %p328_p12, %p327_p11 }
  0x3f   :  { %228 = vmatpush3.bf16.msra.mxu0 %v227_v7  ;;  %p330_p0 = pnand %p329_p13, %p323_p10 }
  0x40   :  { %229 = vmatprep.subr.bf16.mxu0 %v355_v0 }
  0x43   :  { %231 = vmatpush3.bf16.msra.mxu0 %v230_v10 }
  0x44   :  { %232 = vmatprep.subr.bf16.mxu0 %v355_v0 }
  0x47   :  { %234 = vmatpush3.bf16.msra.mxu0 %v233_v13 }
  0x48   :  { %235 = vmatprep.subr.bf16.mxu0 %v355_v0 }
  0x4b   :  { %237 = vmatpush3.bf16.msra.mxu0 %v236_v16 }
  0x4c   :  { %238 = vmatprep.subr.bf16.mxu0 %v355_v0 }
  0x4f   :  { %240 = vmatpush3.bf16.msra.mxu0 %v239_v19 }
  0x50   :  { %241 = vmatprep.subr.bf16.mxu0 %v355_v0 }
  0x53   :  { %243 = vmatpush3.bf16.msra.mxu0 %v242_v22 }
  0x54   :  { %244 = vmatprep.subr.bf16.mxu0 %v355_v0 }
  0x57   :  { %246 = vmatpush3.bf16.msra.mxu0 %v245_v25 }
  0x5a   :  { %221 = vmatmul.mubr.f32.vlgmr.msra.gmra.mrb[0].mxu0 %v65_v26 }
 0x12d   :  { %v148_v28 = vpop.f32.mrb[0].mxu0 }
 0x12e   :  { %v152_v29 = vadd.f32 %v170_v27, %v148_v28  ;;  %v222_v30 = vpop.f32.mrb[1].mxu0 }
 0x130   :  { %153 = vst [vmem:[#allocation8] sm:$0xff] %v152_v29 }
 0x131   :  { %333 = shalt.err (!%p330_p0)
}
 0x132   :  { %s334_s26 = scalar_lea.hbm %s430_s3, 128 }
 0x133   :  { %p335_p1 = scmp.ne.s32.totalorder %s430_s3, %s334_s26  ;;  %p338_p2 = scmp.lt.u32.totalorder %s334_s26, %s430_s3 }
 0x135   :  { %p340_p3 = pnand %p338_p2, %p335_p1 }
 0x137   :  { %343 = shalt.err (!%p340_p3)
}
 0x138   :  { %163 = dma.vmem_to_hbm [thread:$0]  %s161_s22, 128, %s430_s3, [#allocation4]  }
 0x139   :  { %348 = dma.done.wait [#allocation4], 128  }
 0x13a   :  { %349 = vsyncadd [#allocation4], 4294967168 }
 0x13b   :  { %167 = vsyncpa [#allocation3], 1 }
 0x13c   :  { %168 = vsyncpa [#allocation6], 1 }
 0x13d   :  { %169 = vsyncpa [#allocation4], 1 }

</bundles_post_ra>
